<compile_context>
chip_gen: v5e
topology: v5e:2x2
jax: 0.10.0
libtpu: 0.0.40
codegen_flags: <defaults>
</compile_context>

<pallas_src>
import functools

import jax
import jax.numpy as jnp
from jax import lax
from jax.experimental import pallas as pl
from jax.experimental.pallas import tpu as pltpu

STATE_DIM = 4       # CartPole-v1 observation_space.shape[0]
ACTION_DIM = 2      # CartPole-v1 action_space.n
HIDDEN = 128
HEAD_ROWS = 8       # fused actor|critic head padded to a full sublane group
LANE = 128          # lane granularity of the batch (lane) dimension
DEFAULT_TB = 2048   # batch columns per grid step (VMEM use is only ~2 MiB)

assert ACTION_DIM + 1 <= HEAD_ROWS


def _round_up(n, m):
    return -(-n // m) * m


def _choose_tiling(B, tb):
    """Pick (tile, padded batch) minimizing padding and balancing grid steps."""
    b_min = _round_up(max(B, 1), LANE)
    tb_cap = max(LANE, min(_round_up(tb, LANE), b_min))
    n_steps = -(-b_min // tb_cap)
    # v7x has 2 TensorCores: prefer >=2 balanced grid steps when splitting the
    # batch does not add any extra padded rows.
    if n_steps == 1 and b_min >= 2 * LANE and b_min % (2 * LANE) == 0:
        n_steps = 2
    tb_eff = _round_up(-(-b_min // n_steps), LANE)
    b_pad = n_steps * tb_eff
    return tb_eff, b_pad


def actor_critic_kernel(xt_ref, w1_ref, b1_ref, wh_ref, bh_ref, out_ref):
    # Layer 1 (K=4): f32 operands, f32 MXU accumulation. No bf16 casts.
    xt = xt_ref[...]                                            # (STATE_DIM, TB)
    shared = jnp.dot(w1_ref[...], xt, preferred_element_type=jnp.float32)
    shared = jnp.maximum(shared + b1_ref[...], 0.0)             # (HIDDEN, TB)

    # Fused heads: sublane rows [0, ACTION_DIM) = actor logits, row ACTION_DIM
    # = critic value, remaining rows are exact-zero padding.
    head = jnp.dot(wh_ref[...], shared, preferred_element_type=jnp.float32)
    head = head + bh_ref[...]                                   # (HEAD_ROWS, TB)

    # Softmax over the actor rows only; padded rows -> -inf -> exp() == 0.
    row = lax.broadcasted_iota(jnp.int32, head.shape, 0)
    is_policy = row < ACTION_DIM
    logits = jnp.where(is_policy, head, -jnp.inf)
    m = jnp.max(logits, axis=0, keepdims=True)
    e = jnp.exp(logits - m)
    denom = jnp.sum(e, axis=0, keepdims=True)
    policy = e / denom          # exact divide: rows sum to 1 (no approx recip)

    # Single unmasked lane-dense (HEAD_ROWS, TB) store: policy in actor rows,
    # critic value in row ACTION_DIM, zeros elsewhere.
    out_ref[...] = jnp.where(is_policy, policy, head)


@functools.partial(jax.jit, static_argnames=("tb",))
def actor_critic_forward(x, w1, b1, wa, ba, wc, bc, *, tb=DEFAULT_TB):
    """x: (B, STATE_DIM); weights in PyTorch nn.Linear (out, in) layout."""
    B = x.shape[0]
    x = x.astype(jnp.float32)

    # Fuse + pad the two heads into one (HEAD_ROWS, HIDDEN) weight slab.
    w_head = jnp.zeros((HEAD_ROWS, HIDDEN), jnp.float32)
    w_head = w_head.at[:ACTION_DIM, :].set(wa)
    w_head = w_head.at[ACTION_DIM, :].set(wc[0])
    b_head = jnp.zeros((HEAD_ROWS, 1), jnp.float32)
    b_head = b_head.at[:ACTION_DIM, 0].set(ba)
    b_head = b_head.at[ACTION_DIM, 0].set(bc[0])
    b1_col = b1.reshape(HIDDEN, 1)

    tb_eff, b_pad = _choose_tiling(B, tb)

    # Batch-on-lanes layout: x^T is (STATE_DIM, B); output slab is (8, B).
    xt = x.T
    if b_pad != B:
        xt = jnp.pad(xt, ((0, 0), (0, b_pad - B)))

    grid = (b_pad // tb_eff,)
    const = lambda i: (0, 0)
    out = pl.pallas_call(
        actor_critic_kernel,
        out_shape=jax.ShapeDtypeStruct((HEAD_ROWS, b_pad), jnp.float32),
        grid=grid,
        in_specs=[
            pl.BlockSpec((STATE_DIM, tb_eff), lambda i: (0, i)),  # x^T tile
            pl.BlockSpec((HIDDEN, STATE_DIM), const),             # W1 resident
            pl.BlockSpec((HIDDEN, 1), const),                     # b1 resident
            pl.BlockSpec((HEAD_ROWS, HIDDEN), const),             # fused head W
            pl.BlockSpec((HEAD_ROWS, 1), const),                  # fused head b
        ],
        out_specs=pl.BlockSpec((HEAD_ROWS, tb_eff), lambda i: (0, i)),
        compiler_params=pltpu.CompilerParams(
            dimension_semantics=("parallel",)),
    )(xt, w1, b1_col, w_head, b_head)

    policy = out[:ACTION_DIM, :B].T                  # (B, ACTION_DIM)
    value = out[ACTION_DIM:ACTION_DIM + 1, :B].T     # (B, 1)
    return policy, value


def init_params(key):
    """nn.Linear-style U(-1/sqrt(fan_in), 1/sqrt(fan_in)) init, (out,in) layout."""
    ks = jax.random.split(key, 6)

    def linear(kw, kb, fan_in, fan_out):
        bound = 1.0 / jnp.sqrt(jnp.float32(fan_in))
        w = jax.random.uniform(kw, (fan_out, fan_in), jnp.float32, -bound, bound)
        b = jax.random.uniform(kb, (fan_out,), jnp.float32, -bound, bound)
        return w, b

    w1, b1 = linear(ks[0], ks[1], STATE_DIM, HIDDEN)
    wa, ba = linear(ks[2], ks[3], HIDDEN, ACTION_DIM)
    wc, bc = linear(ks[4], ks[5], HIDDEN, 1)
    return w1, b1, wa, ba, wc, bc


def reference_forward(x, w1, b1, wa, ba, wc, bc):
    """Pure-JAX f32 reference matching the PyTorch module."""
    shared = jnp.maximum(x @ w1.T + b1, 0.0)
    logits = shared @ wa.T + ba
    policy = jax.nn.softmax(logits, axis=-1)
    value = shared @ wc.T + bc
    return policy, value


if __name__ == "__main__":
    key = jax.random.PRNGKey(0)
    k_params, k_x, k_x2 = jax.random.split(key, 3)
    params = init_params(k_params)

    # small rollout-style batch
    batch = 8
    x = jax.random.normal(k_x, (batch, STATE_DIM), jnp.float32)
    policy, value = actor_critic_forward(x, *params)
    jax.block_until_ready((policy, value))

    assert policy.shape == (batch, ACTION_DIM)
    assert value.shape == (batch, 1)

    # tolerance covers whichever f32-matmul precision path the backend picks
    ref_p, ref_v = reference_forward(x, *params)
    assert jnp.allclose(policy, ref_p, atol=5e-3, rtol=5e-3)
    assert jnp.allclose(value, ref_v, atol=5e-3, rtol=5e-3)
    # exact softmax normalization inside the kernel (no approx reciprocal)
    assert jnp.allclose(jnp.sum(policy, axis=-1), 1.0, atol=1e-3)

    # non-tile-multiple batch with a small tile: exercises multi-step grid +
    # padding path
    x_big = jax.random.normal(k_x2, (300, STATE_DIM), jnp.float32)
    policy_b, value_b = actor_critic_forward(x_big, *params, tb=128)
    jax.block_until_ready((policy_b, value_b))
    ref_pb, ref_vb = reference_forward(x_big, *params)
    assert policy_b.shape == (300, ACTION_DIM) and value_b.shape == (300, 1)
    assert jnp.allclose(policy_b, ref_pb, atol=5e-3, rtol=5e-3)
    assert jnp.allclose(value_b, ref_vb, atol=5e-3, rtol=5e-3)
    assert jnp.allclose(jnp.sum(policy_b, axis=-1), 1.0, atol=1e-3)

    print("KERNEL_OK")
</pallas_src>

<mosaic_0001>
module attributes {stable_mosaic.version = 11 : i64} {
  func.func @actor_critic_kernel(%arg0: i32, %arg1: memref<4x128xf32, #tpu.memory_space<vmem>>, %arg2: memref<128x4xf32, #tpu.memory_space<vmem>>, %arg3: memref<128x1xf32, #tpu.memory_space<vmem>>, %arg4: memref<8x128xf32, #tpu.memory_space<vmem>>, %arg5: memref<8x1xf32, #tpu.memory_space<vmem>>, %arg6: memref<8x128xf32, #tpu.memory_space<vmem>>) attributes {dimension_semantics = [#tpu.dimension_semantics<parallel>], iteration_bounds = array<i64: 1>, scalar_prefetch = 0 : i64, scratch_operands = 0 : i64, tpu.core_type = #tpu.core_type<tc>, window_params = [{transform_indices = @transform_0, window_bounds = array<i64: 4, 128>}, {pipeline_mode = #tpu.pipeline_mode<synchronous>, transform_indices = @transform_1, window_bounds = array<i64: 128, 4>}, {pipeline_mode = #tpu.pipeline_mode<synchronous>, transform_indices = @transform_2, window_bounds = array<i64: 128, 1>}, {pipeline_mode = #tpu.pipeline_mode<synchronous>, transform_indices = @transform_3, window_bounds = array<i64: 8, 128>}, {pipeline_mode = #tpu.pipeline_mode<synchronous>, transform_indices = @transform_4, window_bounds = array<i64: 8, 1>}, {transform_indices = @transform_5, window_bounds = array<i64: 8, 128>}]} {
    %c0 = arith.constant 0 : index
    %c0_0 = arith.constant 0 : index
    %0 = vector.load %arg1[%c0, %c0_0] : memref<4x128xf32, #tpu.memory_space<vmem>>, vector<4x128xf32>
    %c0_1 = arith.constant 0 : index
    %c0_2 = arith.constant 0 : index
    %1 = vector.load %arg2[%c0_1, %c0_2] : memref<128x4xf32, #tpu.memory_space<vmem>>, vector<128x4xf32>
    %cst = arith.constant dense<0.000000e+00> : vector<128x128xf32>
    %2 = tpu.matmul %1, %0, %cst {dimension_numbers = #tpu.dot_dimension_numbers<[1], [0], [0], [1], [0, 0, 1, 1], [], []>} : vector<128x4xf32>, vector<4x128xf32>, vector<128x128xf32> -> vector<128x128xf32>
    %c0_3 = arith.constant 0 : index
    %c0_4 = arith.constant 0 : index
    %3 = vector.load %arg3[%c0_3, %c0_4] : memref<128x1xf32, #tpu.memory_space<vmem>>, vector<128x1xf32>
    %4 = vector.broadcast %3 : vector<128x1xf32> to vector<128x128xf32>
    %5 = arith.addf %2, %4 : vector<128x128xf32>
    %cst_5 = arith.constant 0.000000e+00 : f32
    %6 = vector.broadcast %cst_5 : f32 to vector<128x128xf32>
    %7 = arith.maximumf %5, %6 : vector<128x128xf32>
    %c0_6 = arith.constant 0 : index
    %c0_7 = arith.constant 0 : index
    %8 = vector.load %arg4[%c0_6, %c0_7] : memref<8x128xf32, #tpu.memory_space<vmem>>, vector<8x128xf32>
    %cst_8 = arith.constant dense<0.000000e+00> : vector<8x128xf32>
    %9 = tpu.matmul %8, %7, %cst_8 {dimension_numbers = #tpu.dot_dimension_numbers<[1], [0], [0], [1], [0, 0, 1, 1], [], []>} : vector<8x128xf32>, vector<128x128xf32>, vector<8x128xf32> -> vector<8x128xf32>
    %c0_9 = arith.constant 0 : index
    %c0_10 = arith.constant 0 : index
    %10 = vector.load %arg5[%c0_9, %c0_10] : memref<8x1xf32, #tpu.memory_space<vmem>>, vector<8x1xf32>
    %11 = vector.broadcast %10 : vector<8x1xf32> to vector<8x128xf32>
    %12 = arith.addf %9, %11 : vector<8x128xf32>
    %13 = tpu.iota {dimensions = array<i32: 0>} : vector<8x128xi32>
    %c2_i32 = arith.constant 2 : i32
    %14 = vector.broadcast %c2_i32 : i32 to vector<8x128xi32>
    %15 = arith.cmpi slt, %13, %14 : vector<8x128xi32>
    %cst_11 = arith.constant 0xFF800000 : f32
    %16 = vector.broadcast %cst_11 : f32 to vector<8x128xf32>
    %17 = arith.select %15, %12, %16 : vector<8x128xi1>, vector<8x128xf32>
    %cst_12 = arith.constant dense<0xFF800000> : vector<128xf32>
    %18 = vector.multi_reduction <maximumf>, %17, %cst_12 [0] : vector<8x128xf32> to vector<128xf32>
    %19 = vector.shape_cast %18 : vector<128xf32> to vector<1x128xf32>
    %20 = vector.broadcast %19 : vector<1x128xf32> to vector<8x128xf32>
    %21 = arith.subf %17, %20 : vector<8x128xf32>
    %22 = math.exp %21 : vector<8x128xf32>
    %cst_13 = arith.constant dense<0.000000e+00> : vector<128xf32>
    %23 = vector.multi_reduction <add>, %22, %cst_13 [0] : vector<8x128xf32> to vector<128xf32>
    %24 = vector.shape_cast %23 : vector<128xf32> to vector<1x128xf32>
    %25 = vector.broadcast %24 : vector<1x128xf32> to vector<8x128xf32>
    %26 = arith.divf %22, %25 : vector<8x128xf32>
    %27 = arith.select %15, %26, %12 : vector<8x128xi1>, vector<8x128xf32>
    %c0_14 = arith.constant 0 : index
    %c0_15 = arith.constant 0 : index
    %28 = vector.load %arg6[%c0_14, %c0_15] : memref<8x128xf32, #tpu.memory_space<vmem>>, vector<8x128xf32>
    tpu.vector_store %arg6[%c0_14, %c0_15], %27 {strides = array<i32>} : memref<8x128xf32, #tpu.memory_space<vmem>>, vector<8x128xf32>,
    return
  }
  func.func @transform_0(%arg0: i32) -> (i32, i32) {
    %c0_i32 = arith.constant 0 : i32
    %c0_i32_0 = arith.constant 0 : i32
    return %c0_i32, %arg0 : i32, i32
  }
  func.func @transform_1(%arg0: i32) -> (i32, i32) {
    %c0_i32 = arith.constant 0 : i32
    %c0_i32_0 = arith.constant 0 : i32
    %c0_i32_1 = arith.constant 0 : i32
    return %c0_i32, %c0_i32_0 : i32, i32
  }
  func.func @transform_2(%arg0: i32) -> (i32, i32) {
    %c0_i32 = arith.constant 0 : i32
    %c0_i32_0 = arith.constant 0 : i32
    %c0_i32_1 = arith.constant 0 : i32
    return %c0_i32, %c0_i32_0 : i32, i32
  }
  func.func @transform_3(%arg0: i32) -> (i32, i32) {
    %c0_i32 = arith.constant 0 : i32
    %c0_i32_0 = arith.constant 0 : i32
    %c0_i32_1 = arith.constant 0 : i32
    return %c0_i32, %c0_i32_0 : i32, i32
  }
  func.func @transform_4(%arg0: i32) -> (i32, i32) {
    %c0_i32 = arith.constant 0 : i32
    %c0_i32_0 = arith.constant 0 : i32
    %c0_i32_1 = arith.constant 0 : i32
    return %c0_i32, %c0_i32_0 : i32, i32
  }
  func.func @transform_5(%arg0: i32) -> (i32, i32) {
    %c0_i32 = arith.constant 0 : i32
    %c0_i32_0 = arith.constant 0 : i32
    return %c0_i32, %arg0 : i32, i32
  }
}

</mosaic_0001>

<bundles_post_ra>
// kernel: actor_critic_forward.1
= control target key start
LH: loop header
LB: loop body
LE: loop exit
PB: predicated region body
PF: predicated region fallthrough
CT: control target
= control target key end

     0   :  { %vm182_vm0 = vcmask 1043456   ;;  %v361_v0 = vmov 0   ;;  %vm133_vm1 = vcmask 31744   ;;  %s524_s2 = inlined_call_operand.vmem [shape: f32[128,1], index: 2, kind: input, shape index: {}]   ;;  %s525_s0 = inlined_call_operand.vmem [shape: f32[4,128], index: 0, kind: input, shape index: {}]   ;;  %s526_s1 = inlined_call_operand.vmem [shape: f32[128,4], index: 1, kind: input, shape index: {}]   ;;  %s527_s4 = inlined_call_operand.vmem [shape: f32[8,1], index: 4, kind: input, shape index: {}]   ;;  %s528_s3 = inlined_call_operand.vmem [shape: f32[8,128], index: 3, kind: input, shape index: {}]   ;;  %s529_s5 = inlined_call_operand.vmem [shape: f32[8,128], index: 5, kind: output, shape index: {}]  }
   0x1   :  { %354 = vset.pattern.permute.xlu0 %v361_v0  ;;  %v52_v1 = vld [vmem:[%s524_s2 + $0x78] sm:$0xff]  ;;  %v20_v2 = vld [vmem:[%s525_s0] sm:$0xf]  ;;  %355 = vset.pattern.permute.xlu1 %v361_v0  ;;  %v27_v4 = vld [vmem:[%s526_s1 + $0x30] sm:$0xff] }
   0x2   :  { %v21_v3 = vld [vmem:[%s526_s1] sm:$0xff]  ;;  %130 = vperm.xlu0 %354, %v52_v1   ;;  %334 = vmatpush.msk.msra.mxu0 %vm182_vm0, %v20_v2  ;;  %v50_v6 = vld [vmem:[%s524_s2 + $0x68] sm:$0xff]  ;;  %v51_v7 = vld [vmem:[%s524_s2 + $0x70] sm:$0xff] }
   0x3   :  { %v33_v5 = vld [vmem:[%s526_s1 + $0x60] sm:$0xff]  ;;  %351 = vmatpush.msk.msra.mxu2 %vm182_vm0, %v20_v2  ;;  %352 = vmatpush.msk.msra.mxu3 %vm182_vm0, %v20_v2  ;;  %v48_v8 = vld [vmem:[%s524_s2 + $0x58] sm:$0xff]  ;;  %v22_v9 = vld [vmem:[%s526_s1 + $0x8] sm:$0xff] }
   0x4   :  { %335 = vmatmul.msk.f32.vlgmr.msra.gmra.mxu0 %vm133_vm1, %v21_v3  ;;  %341 = vmatmul.msk.f32.vlgmr.msra.gmra.mxu2 %vm133_vm1, %v27_v4  ;;  %v28_v10 = vld [vmem:[%s526_s1 + $0x38] sm:$0xff]  ;;  %v34_v11 = vld [vmem:[%s526_s1 + $0x68] sm:$0xff]  ;;  %v49_v12 = vld [vmem:[%s524_s2 + $0x60] sm:$0xff] }
   0x5   :  { %347 = vmatmul.msk.f32.vlgmr.msra.gmra.mxu3 %vm133_vm1, %v33_v5  ;;  %120 = vperm.xlu1 %355, %v50_v6   ;;  %v47_v13 = vld [vmem:[%s524_s2 + $0x50] sm:$0xff]  ;;  %v46_v14 = vld [vmem:[%s524_s2 + $0x48] sm:$0xff]  ;;  %v29_v16 = vld [vmem:[%s526_s1 + $0x40] sm:$0xff] }
   0x6   :  { %356 = vset.pattern.permute.xlu2 %v361_v0  ;;  %v23_v15 = vld [vmem:[%s526_s1 + $0x10] sm:$0xff]  ;;  %v45_v18 = vld [vmem:[%s524_s2 + $0x40] sm:$0xff]  ;;  %v44_v19 = vld [vmem:[%s524_s2 + $0x38] sm:$0xff] }
   0x7   :  { %110 = vperm.xlu2 %356, %v48_v8   ;;  %v35_v17 = vld [vmem:[%s526_s1 + $0x70] sm:$0xff]  ;;  %v24_v21 = vld [vmem:[%s526_s1 + $0x18] sm:$0xff]  ;;  %v30_v22 = vld [vmem:[%s526_s1 + $0x48] sm:$0xff] }
   0x8   :  { %v43_v20 = vld [vmem:[%s524_s2 + $0x30] sm:$0xff]  ;;  %v36_v23 = vld [vmem:[%s526_s1 + $0x78] sm:$0xff]  ;;  %v42_v24 = vld [vmem:[%s524_s2 + $0x28] sm:$0xff] }
   0x9   :  { %v41_v25 = vld [vmem:[%s524_s2 + $0x20] sm:$0xff]  ;;  %v40_v26 = vld [vmem:[%s524_s2 + $0x18] sm:$0xff]  ;;  %v31_v28 = vld [vmem:[%s526_s1 + $0x50] sm:$0xff] }
   0xa   :  { %125 = vperm.xlu0 %354, %v51_v7   ;;  %v25_v27 = vld [vmem:[%s526_s1 + $0x20] sm:$0xff]  ;;  %v39_v29 = vld [vmem:[%s524_s2 + $0x10] sm:$0xff]  ;;  %v38_v30 = vld [vmem:[%s524_s2 + $0x8] sm:$0xff] }
   0xb   :  { %v37_v31 = vld [vmem:[%s524_s2] sm:$0xff]  ;;  %v26_v32 = vld [vmem:[%s526_s1 + $0x28] sm:$0xff]  ;;  %v32_v33 = vld [vmem:[%s526_s1 + $0x58] sm:$0xff] }
   0xc   :  { %336 = vmatmul.msk.f32.gmra.mxu0 %vm133_vm1, %v22_v9  ;;  %342 = vmatmul.msk.f32.gmra.mxu2 %vm133_vm1, %v28_v10  ;;  %v268_v34 = vld [vmem:[%s527_s4] sm:$0xff] }
   0xd   :  { %348 = vmatmul.msk.f32.gmra.mxu3 %vm133_vm1, %v34_v11  ;;  %115 = vperm.xlu1 %355, %v49_v12  }
   0xf   :  { %105 = vperm.xlu2 %356, %v47_v13  }
  0x12   :  { %100 = vperm.xlu0 %354, %v46_v14  }
  0x14   :  { %337 = vmatmul.msk.f32.gmra.mxu0 %vm133_vm1, %v23_v15  ;;  %343 = vmatmul.msk.f32.gmra.mxu2 %vm133_vm1, %v29_v16 }
  0x15   :  { %349 = vmatmul.msk.f32.gmra.mxu3 %vm133_vm1, %v35_v17  ;;  %95 = vperm.xlu1 %355, %v45_v18  }
  0x17   :  { %90 = vperm.xlu2 %356, %v44_v19  }
  0x1a   :  { %85 = vperm.xlu0 %354, %v43_v20  }
  0x1c   :  { %338 = vmatmul.msk.f32.gmra.mxu0 %vm133_vm1, %v24_v21  ;;  %344 = vmatmul.msk.f32.gmra.mxu2 %vm133_vm1, %v30_v22 }
  0x1d   :  { %350 = vmatmul.msk.f32.gmra.mxu3 %vm133_vm1, %v36_v23  ;;  %80 = vperm.xlu1 %355, %v42_v24  }
  0x1f   :  { %75 = vperm.xlu2 %356, %v41_v25  }
  0x22   :  { %70 = vperm.xlu0 %354, %v40_v26  }
  0x24   :  { %339 = vmatmul.msk.f32.gmra.mxu0 %vm133_vm1, %v25_v27  ;;  %345 = vmatmul.msk.f32.gmra.mxu2 %vm133_vm1, %v31_v28 }
  0x25   :  { %65 = vperm.xlu1 %355, %v39_v29  }
  0x27   :  { %60 = vperm.xlu2 %356, %v38_v30  }
  0x2a   :  { %55 = vperm.xlu0 %354, %v37_v31  }
  0x2c   :  { %340 = vmatmul.msk.f32.gmra.mxu0 %vm133_vm1, %v26_v32  ;;  %346 = vmatmul.msk.f32.gmra.mxu2 %vm133_vm1, %v32_v33 }
  0x2d   :  { %271 = vperm.xlu1 %355, %v268_v34  }
  0x61   :  { %v111_v42 = vpop.permute.xlu2 %110 }
  0x69   :  { %v106_v51 = vpop.permute.xlu2 %105 }
  0x71   :  { %v91_v0 = vpop.permute.xlu2 %90 }
  0x74   :  { %v131_v38 = vpop.permute.xlu0 %130 }
  0x77   :  { %v121_v43 = vpop.permute.xlu1 %120 }
  0x79   :  { %v76_v11 = vpop.permute.xlu2 %75 }
  0x7c   :  { %v126_v46 = vpop.permute.xlu0 %125 }
  0x7f   :  { %v116_v50 = vpop.permute.xlu1 %115 }
  0x81   :  { %v510_v35 = vpop.f32.mrf.mxu0  ;;  %v61_v25 = vpop.permute.xlu2 %60 }
  0x84   :  { %v101_v54 = vpop.permute.xlu0 %100 }
  0x87   :  { %v221_v36 = vpop.f32.mrf.mxu2  ;;  %v96_v63 = vpop.permute.xlu1 %95 }
  0x88   :  { %v239_v37 = vpop.f32.mrf.mxu3 }
  0x89   :  { %v512_v39 = vpop.f32.mrf.mxu0  ;;  %v240_v58 = vadd.f32 %v239_v37, %v116_v50  ;;  %v294_v37 = vlaneseq }
  0x8a   :  { %v207_v30 = vadd.f32 %v512_v39, %v61_v25 }
  0x8b   :  { %v263_v62 = vmax.f32 %v240_v58, 0.0 }
  0x8c   :  { %v86_v1 = vpop.permute.xlu0 %85  ;;  %v252_v33 = vmax.f32 %v207_v30, 0.0 }
  0x8d   :  { %v222_v16 = vadd.f32 %v221_v36, %v86_v1  ;;  %v267_v36 = vld [vmem:[%s528_s3] sm:$0xff] }
  0x8f   :  { %v224_v40 = vpop.f32.mrf.mxu2  ;;  %v81_v10 = vpop.permute.xlu1 %80  ;;  %v257_v20 = vmax.f32 %v222_v16, 0.0 }
  0x90   :  { %v242_v41 = vpop.f32.mrf.mxu3  ;;  %v225_v12 = vadd.f32 %v224_v40, %v91_v0 }
  0x91   :  { %v209_v47 = vpop.f32.mrf.mxu0  ;;  %v243_v55 = vadd.f32 %v242_v41, %v121_v43 }
  0x92   :  { %v258_v18 = vmax.f32 %v225_v12, 0.0 }
  0x93   :  { %v264_v60 = vmax.f32 %v243_v55, 0.0 }
  0x94   :  { %v71_v14 = vpop.permute.xlu0 %70 }
  0x97   :  { %v227_v44 = vpop.f32.mrf.mxu2  ;;  %v66_v24 = vpop.permute.xlu1 %65 }
  0x98   :  { %v245_v45 = vpop.f32.mrf.mxu3  ;;  %v228_v8 = vadd.f32 %v227_v44, %v96_v63  ;;  %v210_v26 = vadd.f32 %v209_v47, %v66_v24 }
  0x99   :  { %v246_v52 = vadd.f32 %v245_v45, %v126_v46  ;;  %v212_v56 = vpop.f32.mrf.mxu0 }
  0x9a   :  { %v259_v17 = vmax.f32 %v228_v8, 0.0  ;;  %v213_v22 = vadd.f32 %v212_v56, %v71_v14  ;;  %v253_v31 = vmax.f32 %v210_v26, 0.0 }
  0x9b   :  { %v265_v59 = vmax.f32 %v246_v52, 0.0 }
  0x9c   :  { %v56_v28 = vpop.permute.xlu0 %55  ;;  %v254_v29 = vmax.f32 %v213_v22, 0.0 }
  0x9d   :  { %v204_v32 = vadd.f32 %v510_v35, %v56_v28 }
  0x9f   :  { %v230_v48 = vpop.f32.mrf.mxu2  ;;  %v251_v34 = vmax.f32 %v204_v32, 0.0  ;;  %v272_v40 = vpop.permute.xlu1 %271 }
  0xa0   :  { %v248_v49 = vpop.f32.mrf.mxu3  ;;  %v231_v6 = vadd.f32 %v230_v48, %v101_v54 }
  0xa1   :  { %v249_v53 = vadd.f32 %v248_v49, %v131_v38  ;;  %v215_v2 = vpop.f32.mrf.mxu0  ;;  %v295_v38 = vshrl.u32 %v294_v37, 7 }
  0xa2   :  { %v260_v13 = vmax.f32 %v231_v6, 0.0  ;;  %v216_v21 = vadd.f32 %v215_v2, %v76_v11 }
  0xa3   :  { %v266_v57 = vmax.f32 %v249_v53, 0.0  ;;  %vm296_vm2 = vcmp.lt.s32.totalorder %v295_v38, 2 }
  0xa4   :  { %v255_v27 = vmax.f32 %v216_v21, 0.0 }
  0xa5   :  { %274 = vmatpush.msra.mxu1 %v266_v57 }
  0xa7   :  { %275 = vmatpush.msra.mxu1 %v265_v59  ;;  %v233_v61 = vpop.f32.mrf.mxu2 }
  0xa8   :  { %v234_v4 = vadd.f32 %v233_v61, %v106_v51 }
  0xa9   :  { %276 = vmatpush.msra.mxu1 %v264_v60  ;;  %v218_v15 = vpop.f32.mrf.mxu0 }
  0xaa   :  { %v261_v9 = vmax.f32 %v234_v4, 0.0  ;;  %v219_v19 = vadd.f32 %v218_v15, %v81_v10 }
  0xab   :  { %277 = vmatpush.msra.mxu1 %v263_v62 }
  0xac   :  { %v256_v23 = vmax.f32 %v219_v19, 0.0 }
  0xaf   :  { %v236_v3 = vpop.f32.mrf.mxu2 }
  0xb0   :  { %v237_v5 = vadd.f32 %v236_v3, %v111_v42 }
  0xb2   :  { %v262_v7 = vmax.f32 %v237_v5, 0.0 }
  0xb4   :  { %278 = vmatpush.msra.mxu1 %v262_v7 }
  0xb6   :  { %279 = vmatpush.msra.mxu1 %v261_v9 }
  0xb8   :  { %280 = vmatpush.msra.mxu1 %v260_v13 }
  0xba   :  { %281 = vmatpush.msra.mxu1 %v259_v17 }
  0xbc   :  { %282 = vmatpush.msra.mxu1 %v258_v18 }
  0xbe   :  { %283 = vmatpush.msra.mxu1 %v257_v20 }
  0xc0   :  { %284 = vmatpush.msra.mxu1 %v256_v23 }
  0xc2   :  { %285 = vmatpush.msra.mxu1 %v255_v27 }
  0xc4   :  { %286 = vmatpush.msra.mxu1 %v254_v29 }
  0xc6   :  { %287 = vmatpush.msra.mxu1 %v253_v31 }
  0xc8   :  { %288 = vmatpush.msra.mxu1 %v252_v33 }
  0xca   :  { %289 = vmatpush.msra.mxu1 %v251_v34 }
  0xcb   :  { %290 = vmatmul.f32.vlgmr.msra.gmra.mxu1 %v267_v36 }
 0x148   :  { %v291_v41 = vpop.f32.mrf.mxu1 }
 0x149   :  { %v292_v39 = vadd.f32 %v291_v41, %v272_v40 }
 0x14b   :  { %v297_v42 = vsel %vm296_vm2, %v292_v39, -inf }
 0x14c   :  { %v298_v35 = vrot.slane %v297_v42, 4 }
 0x14e   :  { %v299_v43 = vmax.f32 %v297_v42, %v298_v35 }
 0x150   :  { %v300_v44 = vrot.slane %v299_v43, 2 }
 0x152   :  { %v301_v45 = vmax.f32 %v299_v43, %v300_v44 }
 0x154   :  { %v302_v46 = vrot.slane %v301_v45, 1 }
 0x156   :  { %v303_v47 = vmax.f32 %v301_v45, %v302_v46 }
 0x158   :  { %v304_v48 = vsub.f32 %v297_v42, %v303_v47 }
 0x15a   :  { %v305_v49 = vmul.f32 1.442695, %v304_v48 }
 0x15c   :  { %357 = vpow2.f32 %v305_v49 }
 0x162   :  { %v358_v50 = vpop.eup %357 }
 0x163   :  { %v307_v51 = vrot.slane %v358_v50, 4 }
 0x165   :  { %v308_v52 = vadd.f32 %v358_v50, %v307_v51 }
 0x167   :  { %v309_v53 = vrot.slane %v308_v52, 2 }
 0x169   :  { %v310_v54 = vadd.f32 %v309_v53, %v308_v52 }
 0x16b   :  { %v311_v55 = vrot.slane %v310_v54, 1 }
 0x16d   :  { %v312_v56 = vadd.f32 %v311_v55, %v310_v54 }
 0x16f   :  { %359 = vrcp.f32 %v312_v56  ;;  %v324_v60 = vand.u32 2147483648, %v312_v56  ;;  %v322_v62 = vand.u32 2147483647, %v312_v56  ;;  %vm318_vm4 = vweird.f32 %v312_v56 }
 0x171   :  { %v325_v0 = vor.u32 1.1754944e-38, %v324_v60  ;;  %vm323_vm6 = vcmp.eq.f32.partialorder %v322_v62, 8.507059e+37 }
 0x175   :  { %v360_v57 = vpop.eup %359 }
 0x176   :  { %v314_v58 = vmul.f32 %v360_v57, %v312_v56  ;;  %vm319_vm3 = vweird.f32 %v360_v57 }
 0x177   :  { %vm320_vm5 = vmor %vm318_vm4, %vm319_vm3 }
 0x178   :  { %v315_v59 = vsub.f32 1.0, %v314_v58 }
 0x17a   :  { %v316_v61 = vmul.f32 %v360_v57, %v315_v59 }
 0x17c   :  { %v317_v63 = vadd.f32 %v360_v57, %v316_v61 }
 0x17e   :  { %v321_v1 = vsel %vm320_vm5, %v360_v57, %v317_v63 }
 0x17f   :  { %v326_v2 = vsel %vm323_vm6, %v325_v0, %v321_v1 }
 0x180   :  { %v327_v3 = vmul.f32 %v358_v50, %v326_v2 }
 0x182   :  { %v328_v4 = vsel %vm296_vm2, %v327_v3, %v292_v39 }
 0x183   :  { %329 = vst [vmem:[%s529_s5] sm:$0xff] %v328_v4 }

</bundles_post_ra>
